<compile_context>
chip_gen: v7x
topology: tpu7x:2x2x1
jax: 0.10.0
libtpu: 0.0.40
codegen_flags: <defaults>
</compile_context>

<pallas_src>
import numpy as np
import jax
import jax.numpy as jnp
from jax import lax
from jax.experimental import pallas as pl
from jax.experimental.pallas import tpu as pltpu

SCALE = float(np.sqrt(0.5))
BN_EPS = 1e-5


def _decoder_step_kernel(x_ref, w0_ref, w123_ref, sb_ref, wf_ref, o_ref):
    """Processes one ghost batch (GBN virtual batch) through the GLU chain.

    sb_ref layout (f32, [9, 2*od]):
      rows 0..3 : 0.5 * gamma_i   (GLU i BN weight; sigmoid's 0.5 pre-folded)
      rows 4..7 : 0.5 * beta_i    (GLU i BN bias;   sigmoid's 0.5 pre-folded)
      row  8    : [bf | 0]        (final-fc bias in lanes [:od])
    """
    od = o_ref.shape[-1]

    def glu(x, w, g_half, b_half):
        # Single fused MXU matmul over the full [in, 2*od] weight
        # (bf16 operands, f32 accumulation) — no second serialized matmul.
        h = jnp.dot(x.astype(jnp.bfloat16), w,
                    preferred_element_type=jnp.float32)
        # Training-mode BatchNorm1d on this ghost batch (batch stats, biased
        # variance, two-pass centered var). Pre-BN linear bias omitted: it
        # cancels exactly under batch-mean subtraction.
        mu = jnp.mean(h, axis=0, keepdims=True)
        d = h - mu
        var = jnp.mean(d * d, axis=0, keepdims=True)
        s = g_half * lax.rsqrt(var + BN_EPS)        # tiny [1, 2*od] math
        hn = d * s + b_half                         # == 0.5 * BN(h)
        # value*sigmoid(gate) == (0.5*BN_val) * (tanh(0.5*BN_gate) + 1);
        # the 0.5 factors live in g_half/b_half, tanh rides the EUP slot.
        return hn[:, :od] * (jnp.tanh(hn[:, od:]) + 1.0)

    g_half = lambda i: sb_ref[i:i + 1, :]
    b_half = lambda i: sb_ref[4 + i:5 + i, :]

    y = glu(x_ref[...], w0_ref[...], g_half(0), b_half(0))        # shared[0]
    for i in range(3):                  # shared[1], independ[0], independ[1]
        y = (y + glu(y, w123_ref[i], g_half(i + 1), b_half(i + 1))) * SCALE

    # final fc: Linear(out_dim, out_dim); bias kept (no BN follows it).
    bf = sb_ref[8:9, :od]
    o_ref[...] = jnp.dot(y.astype(jnp.bfloat16), wf_ref[...],
                         preferred_element_type=jnp.float32) + bf


def _pack_params(params, out_dim):
    """Pack the 18 module parameters into 4 slabs so the kernel sees a few
    large DMAs instead of 26 sub-tile ones. Weights go bf16; the f32 slab
    carries pre-halved BN gammas/betas plus the final-fc bias."""
    od = out_dim
    w0 = params[0].astype(jnp.bfloat16)                              # [inp, 2od]
    w123 = jnp.stack([params[4], params[8], params[12]],
                     axis=0).astype(jnp.bfloat16)                    # [3, od, 2od]
    gammas = jnp.concatenate([params[4 * i + 2] for i in range(4)], axis=0)
    betas = jnp.concatenate([params[4 * i + 3] for i in range(4)], axis=0)
    bf_row = jnp.concatenate([params[17], jnp.zeros((1, od), jnp.float32)],
                             axis=1)                                 # [1, 2od]
    sb = jnp.concatenate([0.5 * gammas, 0.5 * betas, bf_row],
                         axis=0).astype(jnp.float32)                 # [9, 2od]
    wf = params[16].astype(jnp.bfloat16)                             # [od, od]
    return w0, w123, sb, wf


def decoder_step_pallas(x, params, out_dim, vbs=1024):
    """params: [w0,b0,g0,be0, ..., w3,b3,g3,be3, wf,bf], weights [in, out].
    x stays f32 (keeps (8,·) sublane blocking simple for ghost-batch chunks);
    it is cast to bf16 right before each MXU dot inside the kernel."""
    B, inp_dim = x.shape
    od = out_dim
    # Ghost Batch Norm chunking: grid over independent virtual batches.
    if B <= vbs:
        num_chunks, cb = 1, B
    else:
        assert B % vbs == 0, "GBN path here requires batch % vbs == 0"
        num_chunks, cb = B // vbs, vbs

    w0, w123, sb, wf = _pack_params(params, od)

    grid_spec = pltpu.PrefetchScalarGridSpec(
        num_scalar_prefetch=0,
        grid=(num_chunks,),
        in_specs=[
            pl.BlockSpec((cb, inp_dim), lambda i: (i, 0)),       # x chunk
            pl.BlockSpec((inp_dim, 2 * od), lambda i: (0, 0)),   # w0 (resident)
            pl.BlockSpec((3, od, 2 * od), lambda i: (0, 0, 0)),  # w1..w3 (resident)
            pl.BlockSpec((9, 2 * od), lambda i: (0, 0)),         # BN/bias slab
            pl.BlockSpec((od, od), lambda i: (0, 0)),            # wf (resident)
        ],
        out_specs=pl.BlockSpec((cb, od), lambda i: (i, 0)),
    )
    return pl.pallas_call(
        _decoder_step_kernel,
        out_shape=jax.ShapeDtypeStruct((B, od), jnp.float32),
        grid_spec=grid_spec,
        compiler_params=pltpu.CompilerParams(
            dimension_semantics=("parallel",)),
    )(x, w0, w123, sb, wf)


def decoder_step_ref(x, params, out_dim, vbs, matmul_dtype=jnp.float32):
    """Pure-JAX textbook reference (full linear bias, two-pass BN per ghost
    batch, jax.nn.sigmoid). matmul_dtype=bfloat16 matches the kernel's MXU
    operand precision for a tight comparison."""
    (w0, b0, g0, be0, w1, b1, g1, be1, w2, b2, g2, be2,
     w3, b3, g3, be3, wf, bf) = params

    def mm(a, w):
        return jnp.dot(a.astype(matmul_dtype), w.astype(matmul_dtype),
                       preferred_element_type=jnp.float32)

    def bn(h, g, be):
        mu = h.mean(0, keepdims=True)
        var = ((h - mu) ** 2).mean(0, keepdims=True)
        return (h - mu) / jnp.sqrt(var + BN_EPS) * g + be

    def gbn(h, g, be):
        if h.shape[0] <= vbs:
            return bn(h, g, be)
        chunks = jnp.split(h, h.shape[0] // vbs, axis=0)
        return jnp.concatenate([bn(c, g, be) for c in chunks], axis=0)

    def glu(x, w, b, g, be):
        h = gbn(mm(x, w) + b, g, be)
        return h[:, :out_dim] * jax.nn.sigmoid(h[:, out_dim:])

    y = glu(x, w0, b0, g0, be0)
    y = (y + glu(y, w1, b1, g1, be1)) * SCALE
    y = (y + glu(y, w2, b2, g2, be2)) * SCALE
    y = (y + glu(y, w3, b3, g3, be3)) * SCALE
    return mm(y, wf) + bf


def init_params(key, inp_dim, out_dim):
    """Deterministic synthetic parameters (shapes from DecoderStep.__init__)."""
    keys = jax.random.split(key, 32)
    ki = iter(range(32))

    def linear(fan_in, fan_out):
        bound = 1.0 / np.sqrt(fan_in)
        w = jax.random.uniform(keys[next(ki)], (fan_in, fan_out),
                               jnp.float32, -bound, bound)
        b = jax.random.uniform(keys[next(ki)], (1, fan_out),
                               jnp.float32, -bound, bound)
        return w, b

    def bn(width):
        g = 1.0 + 0.1 * jax.random.normal(keys[next(ki)], (1, width), jnp.float32)
        be = 0.1 * jax.random.normal(keys[next(ki)], (1, width), jnp.float32)
        return g, be

    params = []
    # GLU 0 (shared[0]): Linear(inp_dim, 2*out) + BN(2*out)
    w, b = linear(inp_dim, 2 * out_dim); g, be = bn(2 * out_dim)
    params += [w, b, g, be]
    # GLU 1 (shared[1]), GLU 2/3 (independent): Linear(out, 2*out) + BN(2*out)
    for _ in range(3):
        w, b = linear(out_dim, 2 * out_dim); g, be = bn(2 * out_dim)
        params += [w, b, g, be]
    # final fc: Linear(out_dim, out_dim)
    wf, bf = linear(out_dim, out_dim)
    params += [wf, bf]
    return params


if __name__ == "__main__":
    # Small shapes consistent with the module: batch 16, inp_dim 16,
    # out_dim 32, virtual batch size 8 -> two ghost batches -> grid=(2,)
    # exercising the parallel grid and the GBN chunking path.
    B, inp_dim, out_dim, vbs = 16, 16, 32, 8

    key = jax.random.PRNGKey(0)
    kx, kp = jax.random.split(key)
    x = jax.random.normal(kx, (B, inp_dim), jnp.float32)
    params = init_params(kp, inp_dim, out_dim)

    out = jax.block_until_ready(decoder_step_pallas(x, params, out_dim, vbs=vbs))

    ref_bf16 = decoder_step_ref(x, params, out_dim, vbs, matmul_dtype=jnp.bfloat16)
    ref_f32 = decoder_step_ref(x, params, out_dim, vbs, matmul_dtype=jnp.float32)
    ref_bf16, ref_f32 = jax.block_until_ready((ref_bf16, ref_f32))

    assert out.shape == (B, out_dim)
    assert bool(jnp.all(jnp.isfinite(out)))
    # Tight check vs a reference with matching bf16 matmul-operand precision
    # (verifies BN fold, bias cancellation, sigmoid identity, GBN chunking).
    assert bool(jnp.allclose(out, ref_bf16, rtol=2e-3, atol=2e-3)), \
        "mismatch vs bf16-operand reference"
    # Loose sanity check vs the full-f32 textbook reference (bf16 rounding).
    assert bool(jnp.allclose(out, ref_f32, rtol=5e-2, atol=5e-2)), \
        "mismatch vs f32 reference"
    print("KERNEL_OK")
</pallas_src>

<mosaic_0001>
module attributes {stable_mosaic.version = 11 : i64} {
  func.func @_decoder_step_kernel(%arg0: i32, %arg1: memref<8x16xf32, #tpu.memory_space<vmem>>, %arg2: memref<16x64xbf16, #tpu.memory_space<vmem>>, %arg3: memref<3x32x64xbf16, #tpu.memory_space<vmem>>, %arg4: memref<9x64xf32, #tpu.memory_space<vmem>>, %arg5: memref<32x32xbf16, #tpu.memory_space<vmem>>, %arg6: memref<8x32xf32, #tpu.memory_space<vmem>>) attributes {dimension_semantics = [#tpu.dimension_semantics<parallel>], iteration_bounds = array<i64: 2>, scalar_prefetch = 0 : i64, scratch_operands = 0 : i64, tpu.core_type = #tpu.core_type<tc>, window_params = [{transform_indices = @transform_0, window_bounds = array<i64: 8, 16>}, {pipeline_mode = #tpu.pipeline_mode<synchronous>, transform_indices = @transform_1, window_bounds = array<i64: 16, 64>}, {pipeline_mode = #tpu.pipeline_mode<synchronous>, transform_indices = @transform_2, window_bounds = array<i64: 3, 32, 64>}, {pipeline_mode = #tpu.pipeline_mode<synchronous>, transform_indices = @transform_3, window_bounds = array<i64: 9, 64>}, {pipeline_mode = #tpu.pipeline_mode<synchronous>, transform_indices = @transform_4, window_bounds = array<i64: 32, 32>}, {transform_indices = @transform_5, window_bounds = array<i64: 8, 32>}]} {
    %c0 = arith.constant 0 : index
    %c0_0 = arith.constant 0 : index
    %0 = vector.load %arg1[%c0, %c0_0] : memref<8x16xf32, #tpu.memory_space<vmem>>, vector<8x16xf32>
    %c0_1 = arith.constant 0 : index
    %c0_2 = arith.constant 0 : index
    %1 = vector.load %arg2[%c0_1, %c0_2] : memref<16x64xbf16, #tpu.memory_space<vmem>>, vector<16x64xbf16>
    %c0_3 = arith.constant 0 : index
    %c0_4 = arith.constant 0 : index
    %2 = vector.load %arg4[%c0_3, %c0_4] : memref<9x64xf32, #tpu.memory_space<vmem>>, vector<1x64xf32>
    %c4 = arith.constant 4 : index
    %c0_5 = arith.constant 0 : index
    %3 = vector.load %arg4[%c4, %c0_5] : memref<9x64xf32, #tpu.memory_space<vmem>>, vector<1x64xf32>
    %4 = arith.truncf %0 : vector<8x16xf32> to vector<8x16xbf16>
    %cst = arith.constant dense<0.000000e+00> : vector<8x64xf32>
    %5 = tpu.matmul %4, %1, %cst {dimension_numbers = #tpu.dot_dimension_numbers<[1], [0], [0], [1], [0, 0, 1, 1], [], []>} : vector<8x16xbf16>, vector<16x64xbf16>, vector<8x64xf32> -> vector<8x64xf32>
    %cst_6 = arith.constant dense<0.000000e+00> : vector<64xf32>
    %6 = vector.multi_reduction <add>, %5, %cst_6 [0] : vector<8x64xf32> to vector<64xf32>
    %7 = vector.shape_cast %6 : vector<64xf32> to vector<1x64xf32>
    %cst_7 = arith.constant 8.000000e+00 : f32
    %8 = vector.broadcast %cst_7 : f32 to vector<1x64xf32>
    %9 = arith.divf %7, %8 : vector<1x64xf32>
    %10 = vector.broadcast %9 : vector<1x64xf32> to vector<8x64xf32>
    %11 = arith.subf %5, %10 : vector<8x64xf32>
    %12 = arith.mulf %11, %11 : vector<8x64xf32>
    %cst_8 = arith.constant dense<0.000000e+00> : vector<64xf32>
    %13 = vector.multi_reduction <add>, %12, %cst_8 [0] : vector<8x64xf32> to vector<64xf32>
    %14 = vector.shape_cast %13 : vector<64xf32> to vector<1x64xf32>
    %cst_9 = arith.constant 8.000000e+00 : f32
    %15 = vector.broadcast %cst_9 : f32 to vector<1x64xf32>
    %16 = arith.divf %14, %15 : vector<1x64xf32>
    %cst_10 = arith.constant 9.99999974E-6 : f32
    %17 = vector.broadcast %cst_10 : f32 to vector<1x64xf32>
    %18 = arith.addf %16, %17 : vector<1x64xf32>
    %19 = math.rsqrt %18 : vector<1x64xf32>
    %20 = arith.mulf %2, %19 : vector<1x64xf32>
    %21 = vector.broadcast %20 : vector<1x64xf32> to vector<8x64xf32>
    %22 = arith.mulf %11, %21 : vector<8x64xf32>
    %23 = vector.broadcast %3 : vector<1x64xf32> to vector<8x64xf32>
    %24 = arith.addf %22, %23 : vector<8x64xf32>
    %25 = vector.extract_strided_slice %24 {offsets = [0, 0], sizes = [8, 32], strides = [1, 1]} : vector<8x64xf32> to vector<8x32xf32>
    %26 = vector.extract_strided_slice %24 {offsets = [0, 32], sizes = [8, 32], strides = [1, 1]} : vector<8x64xf32> to vector<8x32xf32>
    %27 = math.tanh %26 : vector<8x32xf32>
    %cst_11 = arith.constant 1.000000e+00 : f32
    %28 = vector.broadcast %cst_11 : f32 to vector<8x32xf32>
    %29 = arith.addf %27, %28 : vector<8x32xf32>
    %30 = arith.mulf %25, %29 : vector<8x32xf32>
    %c0_12 = arith.constant 0 : index
    %c0_13 = arith.constant 0 : index
    %c0_14 = arith.constant 0 : index
    %31 = vector.load %arg3[%c0_12, %c0_13, %c0_14] : memref<3x32x64xbf16, #tpu.memory_space<vmem>>, vector<1x32x64xbf16>
    %32 = vector.shape_cast %31 : vector<1x32x64xbf16> to vector<32x64xbf16>
    %c1 = arith.constant 1 : index
    %c0_15 = arith.constant 0 : index
    %33 = vector.load %arg4[%c1, %c0_15] : memref<9x64xf32, #tpu.memory_space<vmem>>, vector<1x64xf32>
    %c5 = arith.constant 5 : index
    %c0_16 = arith.constant 0 : index
    %34 = vector.load %arg4[%c5, %c0_16] : memref<9x64xf32, #tpu.memory_space<vmem>>, vector<1x64xf32>
    %35 = arith.truncf %30 : vector<8x32xf32> to vector<8x32xbf16>
    %cst_17 = arith.constant dense<0.000000e+00> : vector<8x64xf32>
    %36 = tpu.matmul %35, %32, %cst_17 {dimension_numbers = #tpu.dot_dimension_numbers<[1], [0], [0], [1], [0, 0, 1, 1], [], []>} : vector<8x32xbf16>, vector<32x64xbf16>, vector<8x64xf32> -> vector<8x64xf32>
    %cst_18 = arith.constant dense<0.000000e+00> : vector<64xf32>
    %37 = vector.multi_reduction <add>, %36, %cst_18 [0] : vector<8x64xf32> to vector<64xf32>
    %38 = vector.shape_cast %37 : vector<64xf32> to vector<1x64xf32>
    %cst_19 = arith.constant 8.000000e+00 : f32
    %39 = vector.broadcast %cst_19 : f32 to vector<1x64xf32>
    %40 = arith.divf %38, %39 : vector<1x64xf32>
    %41 = vector.broadcast %40 : vector<1x64xf32> to vector<8x64xf32>
    %42 = arith.subf %36, %41 : vector<8x64xf32>
    %43 = arith.mulf %42, %42 : vector<8x64xf32>
    %cst_20 = arith.constant dense<0.000000e+00> : vector<64xf32>
    %44 = vector.multi_reduction <add>, %43, %cst_20 [0] : vector<8x64xf32> to vector<64xf32>
    %45 = vector.shape_cast %44 : vector<64xf32> to vector<1x64xf32>
    %cst_21 = arith.constant 8.000000e+00 : f32
    %46 = vector.broadcast %cst_21 : f32 to vector<1x64xf32>
    %47 = arith.divf %45, %46 : vector<1x64xf32>
    %cst_22 = arith.constant 9.99999974E-6 : f32
    %48 = vector.broadcast %cst_22 : f32 to vector<1x64xf32>
    %49 = arith.addf %47, %48 : vector<1x64xf32>
    %50 = math.rsqrt %49 : vector<1x64xf32>
    %51 = arith.mulf %33, %50 : vector<1x64xf32>
    %52 = vector.broadcast %51 : vector<1x64xf32> to vector<8x64xf32>
    %53 = arith.mulf %42, %52 : vector<8x64xf32>
    %54 = vector.broadcast %34 : vector<1x64xf32> to vector<8x64xf32>
    %55 = arith.addf %53, %54 : vector<8x64xf32>
    %56 = vector.extract_strided_slice %55 {offsets = [0, 0], sizes = [8, 32], strides = [1, 1]} : vector<8x64xf32> to vector<8x32xf32>
    %57 = vector.extract_strided_slice %55 {offsets = [0, 32], sizes = [8, 32], strides = [1, 1]} : vector<8x64xf32> to vector<8x32xf32>
    %58 = math.tanh %57 : vector<8x32xf32>
    %cst_23 = arith.constant 1.000000e+00 : f32
    %59 = vector.broadcast %cst_23 : f32 to vector<8x32xf32>
    %60 = arith.addf %58, %59 : vector<8x32xf32>
    %61 = arith.mulf %56, %60 : vector<8x32xf32>
    %62 = arith.addf %30, %61 : vector<8x32xf32>
    %cst_24 = arith.constant 0.707106769 : f32
    %63 = vector.broadcast %cst_24 : f32 to vector<8x32xf32>
    %64 = arith.mulf %62, %63 : vector<8x32xf32>
    %c1_25 = arith.constant 1 : index
    %c0_26 = arith.constant 0 : index
    %c0_27 = arith.constant 0 : index
    %65 = vector.load %arg3[%c1_25, %c0_26, %c0_27] : memref<3x32x64xbf16, #tpu.memory_space<vmem>>, vector<1x32x64xbf16>
    %66 = vector.shape_cast %65 : vector<1x32x64xbf16> to vector<32x64xbf16>
    %c2 = arith.constant 2 : index
    %c0_28 = arith.constant 0 : index
    %67 = vector.load %arg4[%c2, %c0_28] : memref<9x64xf32, #tpu.memory_space<vmem>>, vector<1x64xf32>
    %c6 = arith.constant 6 : index
    %c0_29 = arith.constant 0 : index
    %68 = vector.load %arg4[%c6, %c0_29] : memref<9x64xf32, #tpu.memory_space<vmem>>, vector<1x64xf32>
    %69 = arith.truncf %64 : vector<8x32xf32> to vector<8x32xbf16>
    %cst_30 = arith.constant dense<0.000000e+00> : vector<8x64xf32>
    %70 = tpu.matmul %69, %66, %cst_30 {dimension_numbers = #tpu.dot_dimension_numbers<[1], [0], [0], [1], [0, 0, 1, 1], [], []>} : vector<8x32xbf16>, vector<32x64xbf16>, vector<8x64xf32> -> vector<8x64xf32>
    %cst_31 = arith.constant dense<0.000000e+00> : vector<64xf32>
    %71 = vector.multi_reduction <add>, %70, %cst_31 [0] : vector<8x64xf32> to vector<64xf32>
    %72 = vector.shape_cast %71 : vector<64xf32> to vector<1x64xf32>
    %cst_32 = arith.constant 8.000000e+00 : f32
    %73 = vector.broadcast %cst_32 : f32 to vector<1x64xf32>
    %74 = arith.divf %72, %73 : vector<1x64xf32>
    %75 = vector.broadcast %74 : vector<1x64xf32> to vector<8x64xf32>
    %76 = arith.subf %70, %75 : vector<8x64xf32>
    %77 = arith.mulf %76, %76 : vector<8x64xf32>
    %cst_33 = arith.constant dense<0.000000e+00> : vector<64xf32>
    %78 = vector.multi_reduction <add>, %77, %cst_33 [0] : vector<8x64xf32> to vector<64xf32>
    %79 = vector.shape_cast %78 : vector<64xf32> to vector<1x64xf32>
    %cst_34 = arith.constant 8.000000e+00 : f32
    %80 = vector.broadcast %cst_34 : f32 to vector<1x64xf32>
    %81 = arith.divf %79, %80 : vector<1x64xf32>
    %cst_35 = arith.constant 9.99999974E-6 : f32
    %82 = vector.broadcast %cst_35 : f32 to vector<1x64xf32>
    %83 = arith.addf %81, %82 : vector<1x64xf32>
    %84 = math.rsqrt %83 : vector<1x64xf32>
    %85 = arith.mulf %67, %84 : vector<1x64xf32>
    %86 = vector.broadcast %85 : vector<1x64xf32> to vector<8x64xf32>
    %87 = arith.mulf %76, %86 : vector<8x64xf32>
    %88 = vector.broadcast %68 : vector<1x64xf32> to vector<8x64xf32>
    %89 = arith.addf %87, %88 : vector<8x64xf32>
    %90 = vector.extract_strided_slice %89 {offsets = [0, 0], sizes = [8, 32], strides = [1, 1]} : vector<8x64xf32> to vector<8x32xf32>
    %91 = vector.extract_strided_slice %89 {offsets = [0, 32], sizes = [8, 32], strides = [1, 1]} : vector<8x64xf32> to vector<8x32xf32>
    %92 = math.tanh %91 : vector<8x32xf32>
    %cst_36 = arith.constant 1.000000e+00 : f32
    %93 = vector.broadcast %cst_36 : f32 to vector<8x32xf32>
    %94 = arith.addf %92, %93 : vector<8x32xf32>
    %95 = arith.mulf %90, %94 : vector<8x32xf32>
    %96 = arith.addf %64, %95 : vector<8x32xf32>
    %cst_37 = arith.constant 0.707106769 : f32
    %97 = vector.broadcast %cst_37 : f32 to vector<8x32xf32>
    %98 = arith.mulf %96, %97 : vector<8x32xf32>
    %c2_38 = arith.constant 2 : index
    %c0_39 = arith.constant 0 : index
    %c0_40 = arith.constant 0 : index
    %99 = vector.load %arg3[%c2_38, %c0_39, %c0_40] : memref<3x32x64xbf16, #tpu.memory_space<vmem>>, vector<1x32x64xbf16>
    %100 = vector.shape_cast %99 : vector<1x32x64xbf16> to vector<32x64xbf16>
    %c3 = arith.constant 3 : index
    %c0_41 = arith.constant 0 : index
    %101 = vector.load %arg4[%c3, %c0_41] : memref<9x64xf32, #tpu.memory_space<vmem>>, vector<1x64xf32>
    %c7 = arith.constant 7 : index
    %c0_42 = arith.constant 0 : index
    %102 = vector.load %arg4[%c7, %c0_42] : memref<9x64xf32, #tpu.memory_space<vmem>>, vector<1x64xf32>
    %103 = arith.truncf %98 : vector<8x32xf32> to vector<8x32xbf16>
    %cst_43 = arith.constant dense<0.000000e+00> : vector<8x64xf32>
    %104 = tpu.matmul %103, %100, %cst_43 {dimension_numbers = #tpu.dot_dimension_numbers<[1], [0], [0], [1], [0, 0, 1, 1], [], []>} : vector<8x32xbf16>, vector<32x64xbf16>, vector<8x64xf32> -> vector<8x64xf32>
    %cst_44 = arith.constant dense<0.000000e+00> : vector<64xf32>
    %105 = vector.multi_reduction <add>, %104, %cst_44 [0] : vector<8x64xf32> to vector<64xf32>
    %106 = vector.shape_cast %105 : vector<64xf32> to vector<1x64xf32>
    %cst_45 = arith.constant 8.000000e+00 : f32
    %107 = vector.broadcast %cst_45 : f32 to vector<1x64xf32>
    %108 = arith.divf %106, %107 : vector<1x64xf32>
    %109 = vector.broadcast %108 : vector<1x64xf32> to vector<8x64xf32>
    %110 = arith.subf %104, %109 : vector<8x64xf32>
    %111 = arith.mulf %110, %110 : vector<8x64xf32>
    %cst_46 = arith.constant dense<0.000000e+00> : vector<64xf32>
    %112 = vector.multi_reduction <add>, %111, %cst_46 [0] : vector<8x64xf32> to vector<64xf32>
    %113 = vector.shape_cast %112 : vector<64xf32> to vector<1x64xf32>
    %cst_47 = arith.constant 8.000000e+00 : f32
    %114 = vector.broadcast %cst_47 : f32 to vector<1x64xf32>
    %115 = arith.divf %113, %114 : vector<1x64xf32>
    %cst_48 = arith.constant 9.99999974E-6 : f32
    %116 = vector.broadcast %cst_48 : f32 to vector<1x64xf32>
    %117 = arith.addf %115, %116 : vector<1x64xf32>
    %118 = math.rsqrt %117 : vector<1x64xf32>
    %119 = arith.mulf %101, %118 : vector<1x64xf32>
    %120 = vector.broadcast %119 : vector<1x64xf32> to vector<8x64xf32>
    %121 = arith.mulf %110, %120 : vector<8x64xf32>
    %122 = vector.broadcast %102 : vector<1x64xf32> to vector<8x64xf32>
    %123 = arith.addf %121, %122 : vector<8x64xf32>
    %124 = vector.extract_strided_slice %123 {offsets = [0, 0], sizes = [8, 32], strides = [1, 1]} : vector<8x64xf32> to vector<8x32xf32>
    %125 = vector.extract_strided_slice %123 {offsets = [0, 32], sizes = [8, 32], strides = [1, 1]} : vector<8x64xf32> to vector<8x32xf32>
    %126 = math.tanh %125 : vector<8x32xf32>
    %cst_49 = arith.constant 1.000000e+00 : f32
    %127 = vector.broadcast %cst_49 : f32 to vector<8x32xf32>
    %128 = arith.addf %126, %127 : vector<8x32xf32>
    %129 = arith.mulf %124, %128 : vector<8x32xf32>
    %130 = arith.addf %98, %129 : vector<8x32xf32>
    %cst_50 = arith.constant 0.707106769 : f32
    %131 = vector.broadcast %cst_50 : f32 to vector<8x32xf32>
    %132 = arith.mulf %130, %131 : vector<8x32xf32>
    %c8 = arith.constant 8 : index
    %c0_51 = arith.constant 0 : index
    %133 = vector.load %arg4[%c8, %c0_51] : memref<9x64xf32, #tpu.memory_space<vmem>>, vector<1x32xf32>
    %134 = arith.truncf %132 : vector<8x32xf32> to vector<8x32xbf16>
    %c0_52 = arith.constant 0 : index
    %c0_53 = arith.constant 0 : index
    %135 = vector.load %arg5[%c0_52, %c0_53] : memref<32x32xbf16, #tpu.memory_space<vmem>>, vector<32x32xbf16>
    %cst_54 = arith.constant dense<0.000000e+00> : vector<8x32xf32>
    %136 = tpu.matmul %134, %135, %cst_54 {dimension_numbers = #tpu.dot_dimension_numbers<[1], [0], [0], [1], [0, 0, 1, 1], [], []>} : vector<8x32xbf16>, vector<32x32xbf16>, vector<8x32xf32> -> vector<8x32xf32>
    %137 = vector.broadcast %133 : vector<1x32xf32> to vector<8x32xf32>
    %138 = arith.addf %136, %137 : vector<8x32xf32>
    %c0_55 = arith.constant 0 : index
    %c0_56 = arith.constant 0 : index
    %139 = vector.load %arg6[%c0_55, %c0_56] : memref<8x32xf32, #tpu.memory_space<vmem>>, vector<8x32xf32>
    tpu.vector_store %arg6[%c0_55, %c0_56], %138 {strides = array<i32>} : memref<8x32xf32, #tpu.memory_space<vmem>>, vector<8x32xf32>,
    return
  }
  func.func @transform_0(%arg0: i32) -> (i32, i32) {
    %c0_i32 = arith.constant 0 : i32
    %c0_i32_0 = arith.constant 0 : i32
    return %arg0, %c0_i32 : i32, i32
  }
  func.func @transform_1(%arg0: i32) -> (i32, i32) {
    %c0_i32 = arith.constant 0 : i32
    %c0_i32_0 = arith.constant 0 : i32
    %c0_i32_1 = arith.constant 0 : i32
    return %c0_i32, %c0_i32_0 : i32, i32
  }
  func.func @transform_2(%arg0: i32) -> (i32, i32, i32) {
    %c0_i32 = arith.constant 0 : i32
    %c0_i32_0 = arith.constant 0 : i32
    %c0_i32_1 = arith.constant 0 : i32
    %c0_i32_2 = arith.constant 0 : i32
    return %c0_i32, %c0_i32_0, %c0_i32_1 : i32, i32, i32
  }
  func.func @transform_3(%arg0: i32) -> (i32, i32) {
    %c0_i32 = arith.constant 0 : i32
    %c0_i32_0 = arith.constant 0 : i32
    %c0_i32_1 = arith.constant 0 : i32
    return %c0_i32, %c0_i32_0 : i32, i32
  }
  func.func @transform_4(%arg0: i32) -> (i32, i32) {
    %c0_i32 = arith.constant 0 : i32
    %c0_i32_0 = arith.constant 0 : i32
    %c0_i32_1 = arith.constant 0 : i32
    return %c0_i32, %c0_i32_0 : i32, i32
  }
  func.func @transform_5(%arg0: i32) -> (i32, i32) {
    %c0_i32 = arith.constant 0 : i32
    %c0_i32_0 = arith.constant 0 : i32
    return %arg0, %c0_i32 : i32, i32
  }
}

</mosaic_0001>

<bundles_post_ra>
// kernel: tpu_custom_call.1
= control target key start
LH: loop header
LB: loop body
LE: loop exit
PB: predicated region body
PF: predicated region fallthrough
CT: control target
= control target key end

     0   :  { %10 = vsyncpa [#allocation3], 0  ;;  %s1694_s0 = inlined_call_operand.hbm [shape: f32[16,16], index: 0, kind: input, shape index: {}]   ;;  %s1695_s1 = inlined_call_operand.hbm [shape: bf16[16,64], index: 1, kind: input, shape index: {}]   ;;  %s1696_s2 = inlined_call_operand.hbm [shape: bf16[3,32,64], index: 2, kind: input, shape index: {}]   ;;  %s1697_s3 = inlined_call_operand.hbm [shape: f32[9,64], index: 3, kind: input, shape index: {}]   ;;  %s1698_s4 = inlined_call_operand.hbm [shape: bf16[32,32], index: 4, kind: input, shape index: {}]   ;;  %s1699_s5 = inlined_call_operand.hbm [shape: f32[16,32], index: 5, kind: output, shape index: {}]  }
   0x1   :  { %12 = vsyncpa [#allocation3 + $0x1], 0 }
   0x2   :  { %13 = vsyncpa [#allocation6], 0 }
   0x3   :  { %14 = vsyncpa [#allocation9], 0 }
   0x4   :  { %15 = vsyncpa [#allocation4], 0 }
   0x5   :  { %17 = vsyncpa [#allocation4 + $0x1], 0  ;;  %s1363_s18 = smov 0   ;;  %s1365_s19 = smov 0  }
   0x6   :  { %s1367_s20 = smov 0   ;;  %s1369_s21 = smov 0  }
   0x7 LB: > { %s1320_s22 = smov [#allocation5]   ;;  %s1384_s24 = sadd.s32 4294967295, %s1318_s21   ;;  %s1318_s21 = sphi %s1369_s21, %s1723_s21   ;;  %s1314_s20 = sphi %s1367_s20, %s1722_s20   ;;  %s1310_s19 = sphi %s1365_s19, %s1721_s19   ;;  %s1306_s18 = sphi %s1363_s18, %s1720_s18  }
   0x8   : > { %s176_s23 = sshll.u32 %s1320_s22, 4  ;;  %p893_p0 = scmp.ge.s32.totalorder %s1318_s21, 1  ;;  %s1389_s23 = int_to_ptr.vmem [resolvable:$true] %s176_s23 }
   0x9   : > { %p1700_p1 = scmp.eq.s32.totalorder %s1384_s24, 0  ;;  %p164_p2 = scmp.lt.s32.totalorder %s1318_s21, 3 }
   0xa   : > { %s1321_s26 = smov [#allocation8]   ;;  %s1322_s29 = smov [#allocation7]  }
   0xb   : > { %p1391_p3 = pnand %p893_p0, %p164_p2  ;;  %s202_s27 = sshll.u32 %s1321_s26, 4  ;;  %s1404_s27 = int_to_ptr.vmem [resolvable:$true] %s202_s27 }
   0xc   : > { %s1406_s30 = sshll.u32 %s1322_s29, 4  ;;  %s1102_s8 = scalar_lea.hbm %s1695_s1, 128  ;;  %s190_s30 = int_to_ptr.vmem [resolvable:$true] %s1406_s30 }
   0xd   : > { %s1703_s25 = scalar_select %p1391_p3, 1, 0 }
   0xe   : > { %p1003_p5 = pneg %p1391_p3  ;;  %p1103_p7 = scmp.ne.s32.totalorder %s1695_s1, %s1102_s8 }
   0xf   : > { %p1109_p11 = scmp.lt.u32.totalorder %s1102_s8, %s1695_s1 }
  0x10   : > { %p1400_p6 = pnand %p1003_p5, %p1700_p1 }
  0x12   : > { %p1416_p8 = pneg %p1400_p6 }
  0x14   : > { %p1105_p9 = pnand %p1416_p8, %p1103_p7 }
  0x16   : > { %p1106_p10 = pneg %p1105_p9 }
  0x18   : > { %p1111_p12 = pnand %p1109_p11, %p1106_p10 }
  0x1a   : > { %1114 = shalt.err (!%p1111_p12)
}
  0x1b   : > { %s1115_s14 = scalar_lea.vmem %s1389_s23, 128  ;;  %p1123_p5 = scmp.lt.s32.totalorder %s1389_s23, %s1389_s23 }
  0x1c   : > { %p1116_p13 = scmp.ne.s32.totalorder %s1389_s23, %s1115_s14  ;;  %p1124_p4 = scmp.lt.s32.totalorder %s1115_s14, %s1115_s14 }
  0x1e   : > { %p1118_p0 = pnand %p1116_p13, %p1416_p8  ;;  %p1125_p7 = por %p1124_p4, %p1123_p5 }
  0x20   : > { %p1119_p2 = pneg %p1118_p0 }
  0x22   : > { %p1126_p9 = pnand %p1125_p7, %p1119_p2 }
  0x24   : > { %1129 = shalt.err (!%p1126_p9)
}
  0x25   : > { %s1323_s15 = smov 64   ;;  %s1324_s16 = smov 4  }
  0x26   : > { %1006 = dma.hbm_to_vmem [thread:$0]  (!%p1400_p6), %s1695_s1, 128, %s1389_s23, [#allocation6], %s1323_s15, %s1323_s15, %s1324_s16  }
  0x27   : > { %s1130_s6 = scalar_lea.hbm %s1697_s3, 256 }
  0x28   : > { %p1131_p4 = scmp.ne.s32.totalorder %s1697_s3, %s1130_s6  ;;  %p1137_p12 = scmp.lt.u32.totalorder %s1130_s6, %s1697_s3 }
  0x2a   : > { %p1133_p10 = pnand %p1131_p4, %p1416_p8 }
  0x2c   : > { %p1134_p11 = pneg %p1133_p10 }
  0x2e   : > { %p1139_p13 = pnand %p1137_p12, %p1134_p11 }
  0x30   : > { %1142 = shalt.err (!%p1139_p13)
}
  0x31   : > { %s1143_s23 = scalar_lea.vmem %s1404_s27, 256  ;;  %p1151_p7 = scmp.lt.s32.totalorder %s1404_s27, %s1404_s27 }
  0x32   : > { %p1144_p0 = scmp.ne.s32.totalorder %s1404_s27, %s1143_s23  ;;  %p1152_p9 = scmp.lt.s32.totalorder %s1143_s23, %s1143_s23 }
  0x34   : > { %p1146_p2 = pnand %p1144_p0, %p1416_p8  ;;  %p1153_p4 = por %p1152_p9, %p1151_p7 }
  0x36   : > { %p1147_p5 = pneg %p1146_p2 }
  0x38   : > { %p1154_p10 = pnand %p1153_p4, %p1147_p5 }
  0x3a   : > { %1157 = shalt.err (!%p1154_p10)
}
  0x3b   : > { %s1325_s12 = smov 128   ;;  %s1326_s13 = smov 8  }
  0x3c   : > { %1012 = dma.hbm_to_vmem [thread:$0]  (!%p1400_p6), %s1697_s3, 256, %s1404_s27, [#allocation9], %s1325_s12, %s1325_s12, %s1326_s13  }
  0x3d   : > { %s1158_s29 = scalar_lea.hbm %s1696_s2, 768 }
  0x3e   : > { %p1159_p11 = scmp.ne.s32.totalorder %s1696_s2, %s1158_s29  ;;  %p1165_p0 = scmp.lt.u32.totalorder %s1158_s29, %s1696_s2 }
  0x40   : > { %p1161_p12 = pnand %p1159_p11, %p1416_p8 }
  0x42   : > { %p1162_p13 = pneg %p1161_p12 }
  0x44   : > { %p1167_p2 = pnand %p1165_p0, %p1162_p13 }
  0x46   : > { %1170 = shalt.err (!%p1167_p2)
}
  0x47   : > { %s1171_s10 = scalar_lea.vmem %s190_s30, 768  ;;  %p1179_p4 = scmp.lt.s32.totalorder %s190_s30, %s190_s30 }
  0x48   : > { %p1172_p5 = scmp.ne.s32.totalorder %s190_s30, %s1171_s10  ;;  %p1180_p10 = scmp.lt.s32.totalorder %s1171_s10, %s1171_s10 }
  0x4a   : > { %p1174_p7 = pnand %p1172_p5, %p1416_p8  ;;  %p1181_p1 = por %p1180_p10, %p1179_p4 }
  0x4c   : > { %p1175_p9 = pneg %p1174_p7 }
  0x4e   : > { %p1182_p3 = pnand %p1181_p1, %p1175_p9 }
  0x50   : > { %1185 = shalt.err (!%p1182_p3)
}
  0x51   : > { %1009 = dma.hbm_to_vmem [thread:$0]  (!%p1400_p6), %s1696_s2, 768, %s190_s30, [#allocation6], %s1323_s15, %s1323_s15, %s1324_s16  }
  0x52   : > { %s1327_s12 = smov [#allocation10]   ;;  %s1186_s22 = scalar_lea.hbm %s1698_s4, 256 }
  0x53   : > { %s215_s13 = sshll.u32 %s1327_s12, 4  ;;  %p1187_p1 = scmp.ne.s32.totalorder %s1698_s4, %s1186_s22  ;;  %s216_s13 = int_to_ptr.vmem [resolvable:$true] %s215_s13 }
  0x54   : > { %p1193_p12 = scmp.lt.u32.totalorder %s1186_s22, %s1698_s4 }
  0x55   : > { %p1189_p3 = pnand %p1187_p1, %p1416_p8 }
  0x57   : > { %p1190_p11 = pneg %p1189_p3 }
  0x59   : > { %p1195_p13 = pnand %p1193_p12, %p1190_p11 }
  0x5b   : > { %1198 = shalt.err (!%p1195_p13)
}
  0x5c   : > { %s1199_s30 = scalar_lea.vmem %s216_s13, 256  ;;  %p1207_p7 = scmp.lt.s32.totalorder %s216_s13, %s216_s13 }
  0x5d   : > { %p1200_p0 = scmp.ne.s32.totalorder %s216_s13, %s1199_s30  ;;  %p1208_p9 = scmp.lt.s32.totalorder %s1199_s30, %s1199_s30 }
  0x5f   : > { %p1202_p2 = pnand %p1200_p0, %p1416_p8  ;;  %p1209_p4 = por %p1208_p9, %p1207_p7 }
  0x61   : > { %p1203_p5 = pneg %p1202_p2 }
  0x63   : > { %p1210_p10 = pnand %p1209_p4, %p1203_p5 }
  0x65   : > { %1213 = shalt.err (!%p1210_p10)
}
  0x66   : > { %1015 = dma.hbm_to_vmem [thread:$0]  (!%p1400_p6), %s1698_s4, 256, %s216_s13, [#allocation9], %s1323_s15, %s1323_s15, %s1324_s16  }
  0x67   : > { %s892_s28 = sadd.s32 4294967294, %s1318_s21   ;;  %s1508_s11 = sadd.s32 1, %s1318_s21  }
  0x68   : > { %s27_s10 = ssub.s32 %s1318_s21, %s1508_s11  ;;  %s30_s27 = sadd.s32 1, %s1314_s20 }
  0x69   : > { %p28_p8 = scmp.eq.s32.totalorder %s27_s10, 0  ;;  %p37_p1 = scmp.ne.s32.totalorder %s1314_s20, %s1310_s19 }
  0x6a   : > { %p38_p3 = scmp.eq.s32.totalorder %s1318_s21, 0  ;;  %p43_p11 = scmp.ne.s32.totalorder %s1310_s19, %s1306_s18 }
  0x6b   : > { %s1519_s23 = scalar_select %p28_p8, %s1314_s20, %s30_s27  }
  0x6c   : > { %p1521_p12 = por %p38_p3, %p37_p1  ;;  %p1707_p13 = scmp.eq.s32.totalorder %s1384_s24, 0 }
  0x6d   : > { %p151_p0 = scmp.eq.s32.totalorder %s1384_s24, 1  ;;  %p157_p2 = scmp.eq.s32.totalorder %s892_s28, 1 }
  0x6e   : > { %p1527_p6 = por %p1707_p13, %p43_p11  ;;  %p1028_p5 = scmp.lt.s32.totalorder %s1318_s21, 2 }
  0x6f   : > { %s229_s16 = sand.u32 1, %s1314_s20   ;;  %p1534_p7 = por %p151_p0, %p37_p1 }
  0x70   : > { %p1538_p9 = por %p157_p2, %p43_p11  ;;  %s899_s17 = sshll.u32 %s229_s16, 3 }
  0x71   : > { %s1709_s13 = scalar_select %p1534_p7, 1, 0 }
  0x72   : > { %s1710_s14 = scalar_select %p1538_p9, 1, 0 }
  0x73   : > { %s900_s22 = sshll.u32 %s1318_s21, 7  ;;  %s233_s7 = scalar_lea.vmem [#allocation2], %s899_s17 }
  0x74   : > { %s1546_s6 = scalar_lea.hbm %s1694_s0, %s900_s22  ;;  %s240_s30 = sshll.u32 %s233_s7, 4  ;;  %s1548_s30 = int_to_ptr.vmem [resolvable:$true] %s240_s30 }
  0x75   : > { %p1552_p4 = pnand %p1028_p5, %p1521_p12  ;;  %s230_s9 = scalar_lea.sflag [#allocation3], %s229_s16 }
  0x76   : > { %s1214_s28 = scalar_lea.hbm %s1546_s6, 128  ;;  %s1219_s17 = scalar_lea.hbm %s1694_s0, 256 }
  0x77   : > { %p1215_p10 = scmp.ne.s32.totalorder %s1546_s6, %s1214_s28  ;;  %p1216_p8 = pneg %p1552_p4 }
  0x78   : > { %p1220_p11 = scmp.lt.u32.totalorder %s1546_s6, %s1694_s0  ;;  %p1221_p12 = scmp.lt.u32.totalorder %s1219_s17, %s1214_s28 }
  0x79   : > { %p1217_p1 = pnand %p1216_p8, %p1215_p10  ;;  %p1223_p0 = scmp.lt.u32.totalorder %s1214_s28, %s1546_s6 }
  0x7a   : > { %p1222_p13 = por %p1221_p12, %p1220_p11 }
  0x7b   : > { %p1218_p3 = pneg %p1217_p1 }
  0x7c   : > { %p1224_p2 = por %p1223_p0, %p1222_p13 }
  0x7e   : > { %p1225_p5 = pnand %p1224_p2, %p1218_p3 }
  0x80   : > { %1228 = shalt.err (!%p1225_p5)
}
  0x81   : > { %s1229_s16 = scalar_lea.vmem %s1548_s30, 128  ;;  %s1328_s26 = smov [#allocation2]  }
  0x82   : > { %p1230_p10 = scmp.ne.s32.totalorder %s1548_s30, %s1229_s16  ;;  %s1234_s29 = sshll.u32 %s1328_s26, 4  ;;  %s1235_s29 = int_to_ptr.vmem [resolvable:$false] %s1234_s29 }
  0x83   : > { %s1236_s7 = scalar_lea.vmem %s1235_s29, 256  ;;  %p1237_p7 = scmp.lt.s32.totalorder %s1548_s30, %s1235_s29 }
  0x84   : > { %p1232_p1 = pnand %p1230_p10, %p1216_p8  ;;  %p1238_p11 = scmp.lt.s32.totalorder %s1236_s7, %s1229_s16 }
  0x86   : > { %p1233_p9 = pneg %p1232_p1  ;;  %p1239_p12 = por %p1238_p11, %p1237_p7 }
  0x88   : > { %p1240_p13 = pnand %p1239_p12, %p1233_p9 }
  0x8a   : > { %1243 = shalt.err (!%p1240_p13)
}
  0x8b   : > { %1019 = dma.hbm_to_vmem [thread:$0]  (!%p1552_p4), %s1546_s6, 128, %s1548_s30, %s230_s9  }
  0x8c   : > { %p1712_p3 = scmp.ne.s32.totalorder %s1703_s25, 0 }
  0x8d   : > { %s1584_s28 = sand.u32 (!%p1712_p3), 1, %s1310_s19  }
  0x8e   : > { %249 = sbr.rel (%p1712_p3) target bundleno = 1998 (0x7ce), region = 40  ;;  %s902_s10 = sshll.u32 (!%p1712_p3), %s1584_s28, 3 }
  0x8f   : > { %s252_s27 = scalar_lea.sflag (!%p1712_p3), [#allocation3], %s1584_s28  ;;  %s255_s17 = scalar_lea.vmem (!%p1712_p3), [#allocation2], %s902_s10 }
  0x95   : > { %1289 = dma.done.wait (%p1527_p6), %s252_s27, 128  }
  0x96   : > { %1291 = vsyncadd (%p1527_p6), %s252_s27, 4294967168  ;;  %p1713_p7 = scmp.eq.s32.totalorder %s1384_s24, 0 }
  0x98   : > { %1293 = dma.done.wait (%p1713_p7), [#allocation6], 896   ;;  %p1714_p9 = pmov %p1713_p7 }
  0x99   : > { %p1715_p4 = pmov %p1713_p7 }
  0x9a   : > { %1295 = vsyncadd (%p1714_p9), [#allocation6], 4294966400 }
  0x9b   : > { %1297 = dma.done.wait (%p1715_p4), [#allocation9], 512   ;;  %p1716_p8 = pmov %p1715_p4 }
  0x9c   : > { %v1329_v0 = vmov 0.0   ;;  %vm1330_vm0 = vmmov 0   ;;  %v1077_v1 = vld [vmem:[#allocation5] sm:$0xff]   ;;  %v299_v2 = vld [vmem:[%s255_s17] sm:$0xff]  ;;  %vm311_vm1 = vcmask 130048   ;;  %v1078_v4 = vld [vmem:[#allocation7] sm:$0xff]   ;;  %v378_v28 = vlaneseq }
  0x9d   : > { %1299 = vsyncadd (%p1716_p8), [#allocation9], 4294966784  ;;  %945 = vmatprep.subr.bf16.mxu0 %v1329_v0  ;;  %947 = vmatprep.mubr.msk.bf16.mxu0 %vm1330_vm0, %v1329_v0  ;;  %v304_v3 = vpack.c.bf16 %v299_v2, %v299_v2  ;;  %vm355_vm2 = vcmask 523264   ;;  %v302_v30 = vld [vmem:[#allocation8] sm:$0x1]  ;;  %v1079_v38 = vld [vmem:[#allocation7 + $0x8] sm:$0xff]  }
  0x9e   : > { %951 = vmatprep.subr.bf16.mxu1 %v1329_v0  ;;  %955 = vmatprep.mubr.msk.bf16.mxu1 %vm1330_vm0, %v1329_v0  ;;  %v379_v29 = vshrl.u32 %v378_v28, 7  ;;  %v910_v35 = vld [vmem:[#allocation8 + $0x4] ss:$0 sm:$0xff]  ;;  %s1331_s25 = smov 96   ;;  %vm414_vm3 = vcmask 261120   ;;  %s928_s15 = sshll.u32 %s1384_s24, 7 }
  0x9f   : > { %946 = vmatpush3.bf16.msra.mxu0 %v1077_v1  ;;  %952 = vmatpush3.bf16.msra.mxu1 %v1078_v4  ;;  %v399_v4 = vld [vmem:[#allocation8 + $0x1] sm:$0x1]  ;;  %s297_s6 = scalar_lea.vmem [#allocation11], %s902_s10  ;;  %s1649_s12 = scalar_lea.hbm %s1699_s5, %s928_s15 }
  0xa0   : > { %959 = vmatprep.subr.bf16.mxu0 %v1329_v0  ;;  %953 = vmatprep.subr.bf16.mxu1 %v1329_v0  ;;  %v1614_v31 = vsub.s32 0, %v379_v29  ;;  %s784_s30 = sshll.u32 %s297_s6, 4  ;;  %s771_s24 = scalar_lea.sflag [#allocation4], %s1584_s28  ;;  %s1651_s30 = int_to_ptr.vmem [resolvable:$true] %s784_s30 }
  0xa1   : > { %s1244_s22 = scalar_lea.vmem %s1651_s30, 128  ;;  %p1717_p0 = scmp.ne.s32.totalorder %s1709_s13, 0 }
  0xa2   : > { %948 = vmatmul.mubr.msk.bf16.vlgmr.msra.gmra.mrb[0].mxu0 %vm311_vm1, %v304_v3  ;;  %p1245_p6 = scmp.ne.s32.totalorder %s1651_s30, %s1244_s22  ;;  %s1332_s16 = smov [#allocation11]  }
  0xa3   : > { %963 = vmatprep.mubr.msk.bf16.mxu0 %vm1330_vm0, %v1329_v0  ;;  %954 = vmatpush3.bf16.msra.mxu1 %v1079_v38  ;;  %s1248_s26 = sshll.u32 %s1332_s16, 4  ;;  %s1249_s26 = int_to_ptr.vmem [resolvable:$false] %s1248_s26 }
  0xa4   : > { %967 = vmatprep.subr.bf16.mxu1 %v1329_v0  ;;  %p1246_p2 = pnand %p1245_p6, %p1717_p0  ;;  %s1250_s29 = scalar_lea.vmem %s1249_s26, 256 }
  0xa5   : > { %p1251_p10 = scmp.lt.s32.totalorder %s1651_s30, %s1249_s26  ;;  %p1252_p1 = scmp.lt.s32.totalorder %s1250_s29, %s1244_s22 }
  0xa6   : > { %p1247_p5 = pneg %p1246_p2 }
  0xa7   : > { %p1253_p11 = por %p1252_p1, %p1251_p10 }
  0xa9   : > { %p1254_p12 = pnand %p1253_p11, %p1247_p5 }
 0x175   : > { %v349_v5 = vpop.f32.mrb[0].mxu0 }
 0x176   : > { %v356_v6 = vsel %vm355_vm2, %v349_v5, 0.0  ;;  %v949_v7 = vpop.f32.mrb[1].mxu0 }
 0x177   : > { %v357_v8 = vrot.slane %v356_v6, 4  ;;  %v352_v9 = vpop.f32.mrb[2].mxu0 }
 0x178   : > { %v950_v10 = vpop.f32.mrb[3].mxu0 }
 0x179   : > { %v358_v11 = vadd.f32 %v357_v8, %v356_v6  ;;  %v914_v8 = vld [vmem:[#allocation8 + $0x5] ss:$0 sm:$0xff] }
 0x17b   : > { %v359_v12 = vrot.slane %v358_v11, 2 }
 0x17d   : > { %v360_v13 = vadd.f32 %v359_v12, %v358_v11  ;;  %v1080_v11 = vld [vmem:[#allocation7 + $0x10] sm:$0xff]   ;;  %v1081_v12 = vld [vmem:[#allocation7 + $0x18] sm:$0xff]  }
 0x17e   : > { %960 = vmatpush3.bf16.msra.mxu0 %v1080_v11 }
 0x17f   : > { %v361_v14 = vrot.slane %v360_v13, 1  ;;  %961 = vmatprep.subr.bf16.mxu0 %v1329_v0 }
 0x181   : > { %v362_v15 = vadd.f32 %v361_v14, %v360_v13 }
 0x182   : > { %962 = vmatpush3.bf16.msra.mxu0 %v1081_v12 }
 0x183   : > { %v364_v16 = vmul.f32 0.125, %v362_v15  ;;  %975 = vmatprep.subr.bf16.mxu0 %v1329_v0 }
 0x185   : > { %v365_v17 = vsub.f32 %v349_v5, %v364_v16 }
 0x187   : > { %v366_v18 = vmul.f32 %v365_v17, %v365_v17 }
 0x189   : > { %v367_v19 = vsel %vm355_vm2, %v366_v18, 0.0 }
 0x18a   : > { %v368_v20 = vrot.slane %v367_v19, 4 }
 0x18c   : > { %v369_v21 = vadd.f32 %v368_v20, %v367_v19 }
 0x18e   : > { %v370_v22 = vrot.slane %v369_v21, 2 }
 0x190   : > { %v371_v23 = vadd.f32 %v370_v22, %v369_v21 }
 0x192   : > { %v372_v24 = vrot.slane %v371_v23, 1 }
 0x194   : > { %v373_v25 = vadd.f32 %v372_v24, %v371_v23 }
 0x196   : > { %v374_v26 = vmul.f32 0.125, %v373_v25 }
 0x198   : > { %v375_v27 = vadd.f32 1e-05, %v374_v26 }
 0x19a   : > { %1086 = vrsqrt.f32 %v375_v27 }
 0x1a4   : > { %v1087_v32 = vpop.eup %1086 }
 0x1a5   : > { %v377_v33 = vmul.f32 %v1087_v32, %v302_v30 }
 0x1a7   : > { %v381_v34 = vrot.slane %v377_v33, %v1614_v31 }
 0x1a9   : > { %v382_v36 = vmul.f32 %v381_v34, %v365_v17 }
 0x1ab   : > { %v387_v37 = vadd.f32 %v910_v35, %v382_v36 }
 0x1ad   : > { %1088 = vtanh.f32 %v387_v37 }
 0x1b7   : > { %v1089_v39 = vpop.eup %1088 }
 0x1b8   : > { %v389_v40 = vadd.f32 1.0, %v1089_v39 }
 0x1ba   : > { %391 = vrot.lane.b32.xlu0 %v389_v40, %s1331_s25 }
 0x22c   : > { %v392_v41 = vpop.permute.xlu0 %391 }
 0x22d   : > { %v394_v42 = vmul.f32 %v392_v41, %v387_v37 }
 0x22f   : > { %v401_v43 = vpack.c.bf16 %v394_v42, %v394_v42 }
 0x231   : > { %956 = vmatmul.mubr.msk.bf16.vlgmr.msra.gmra.mrb[0].mxu1 %vm414_vm3, %v401_v43 }
 0x232   : > { %971 = vmatprep.mubr.msk.bf16.mxu1 %vm1330_vm0, %v1329_v0 }
 0x304   : > { %v452_v44 = vpop.f32.mrb[0].mxu1 }
 0x305   : > { %v458_v45 = vsel %vm355_vm2, %v452_v44, 0.0  ;;  %v957_v46 = vpop.f32.mrb[1].mxu1 }
 0x306   : > { %v459_v47 = vrot.slane %v458_v45, 4  ;;  %v455_v48 = vpop.f32.mrb[2].mxu1 }
 0x307   : > { %v958_v49 = vpop.f32.mrb[3].mxu1  ;;  %v918_v48 = vld [vmem:[#allocation8 + $0x6] ss:$0 sm:$0xff] }
 0x308   : > { %v460_v50 = vadd.f32 %v459_v47, %v458_v45 }
 0x30a   : > { %v461_v51 = vrot.slane %v460_v50, 2 }
 0x30c   : > { %v462_v52 = vadd.f32 %v461_v51, %v460_v50  ;;  %v1082_v51 = vld [vmem:[#allocation7 + $0x20] sm:$0xff]  }
 0x30d   : > { %968 = vmatpush3.bf16.msra.mxu1 %v1082_v51 }
 0x30e   : > { %v463_v53 = vrot.slane %v462_v52, 1  ;;  %969 = vmatprep.subr.bf16.mxu1 %v1329_v0 }
 0x310   : > { %v464_v54 = vadd.f32 %v463_v53, %v462_v52  ;;  %v1083_v52 = vld [vmem:[#allocation7 + $0x28] sm:$0xff]  }
 0x311   : > { %970 = vmatpush3.bf16.msra.mxu1 %v1083_v52 }
 0x312   : > { %v465_v55 = vmul.f32 0.125, %v464_v54 }
 0x314   : > { %v466_v56 = vsub.f32 %v452_v44, %v465_v55  ;;  %v503_v44 = vld [vmem:[#allocation8 + $0x2] sm:$0x1] }
 0x316   : > { %v467_v57 = vmul.f32 %v466_v56, %v466_v56 }
 0x318   : > { %v468_v58 = vsel %vm355_vm2, %v467_v57, 0.0 }
 0x319   : > { %v469_v59 = vrot.slane %v468_v58, 4 }
 0x31b   : > { %v470_v60 = vadd.f32 %v469_v59, %v468_v58 }
 0x31d   : > { %v471_v61 = vrot.slane %v470_v60, 2 }
 0x31f   : > { %v472_v62 = vadd.f32 %v471_v61, %v470_v60 }
 0x321   : > { %v473_v63 = vrot.slane %v472_v62, 1 }
 0x323   : > { %v474_v1 = vadd.f32 %v473_v63, %v472_v62 }
 0x325   : > { %v475_v2 = vmul.f32 0.125, %v474_v1 }
 0x327   : > { %v476_v3 = vadd.f32 1e-05, %v475_v2 }
 0x329   : > { %1090 = vrsqrt.f32 %v476_v3 }
 0x333   : > { %v1091_v5 = vpop.eup %1090 }
 0x334   : > { %v478_v6 = vmul.f32 %v1091_v5, %v399_v4 }
 0x336   : > { %v482_v7 = vrot.slane %v478_v6, %v1614_v31 }
 0x338   : > { %v483_v9 = vmul.f32 %v482_v7, %v466_v56 }
 0x33a   : > { %v488_v10 = vadd.f32 %v914_v8, %v483_v9 }
 0x33c   : > { %1092 = vtanh.f32 %v488_v10 }
 0x346   : > { %v1093_v13 = vpop.eup %1092 }
 0x347   : > { %v490_v14 = vadd.f32 1.0, %v1093_v13 }
 0x349   : > { %492 = vrot.lane.b32.xlu0 %v490_v14, %s1331_s25 }
 0x3bb   : > { %v493_v15 = vpop.permute.xlu0 %492 }
 0x3bc   : > { %v495_v16 = vmul.f32 %v493_v15, %v488_v10 }
 0x3be   : > { %v496_v17 = vadd.f32 %v495_v16, %v394_v42 }
 0x3c0   : > { %v497_v18 = vmul.f32 0.70710677, %v496_v17 }
 0x3c2   : > { %v505_v19 = vpack.c.bf16 %v497_v18, %v497_v18 }
 0x3c4   : > { %964 = vmatmul.mubr.msk.bf16.vlgmr.msra.gmra.mrb[4].mxu0 %vm414_vm3, %v505_v19 }
 0x3c5   : > { %979 = vmatprep.mubr.msk.bf16.mxu0 %vm1330_vm0, %v1329_v0 }
 0x497   : > { %v555_v20 = vpop.f32.mrb[4].mxu0 }
 0x498   : > { %v561_v21 = vsel %vm355_vm2, %v555_v20, 0.0  ;;  %v965_v22 = vpop.f32.mrb[5].mxu0 }
 0x499   : > { %v562_v23 = vrot.slane %v561_v21, 4  ;;  %v558_v24 = vpop.f32.mrb[6].mxu0 }
 0x49a   : > { %v966_v25 = vpop.f32.mrb[7].mxu0  ;;  %v922_v24 = vld [vmem:[#allocation8 + $0x7] ss:$0 sm:$0xff] }
 0x49b   : > { %v563_v26 = vadd.f32 %v562_v23, %v561_v21 }
 0x49d   : > { %v564_v27 = vrot.slane %v563_v26, 2 }
 0x49f   : > { %v565_v28 = vadd.f32 %v564_v27, %v563_v26  ;;  %v1084_v27 = vld [vmem:[#allocation10] sm:$0xff]  }
 0x4a0   : > { %976 = vmatpush3.bf16.msra.mxu0 %v1084_v27 }
 0x4a1   : > { %v566_v29 = vrot.slane %v565_v28, 1  ;;  %977 = vmatprep.subr.bf16.mxu0 %v1329_v0 }
 0x4a3   : > { %v567_v30 = vadd.f32 %v566_v29, %v565_v28  ;;  %v1085_v28 = vld [vmem:[#allocation10 + $0x8] sm:$0xff]  }
 0x4a4   : > { %978 = vmatpush3.bf16.msra.mxu0 %v1085_v28 }
 0x4a5   : > { %v568_v32 = vmul.f32 0.125, %v567_v30 }
 0x4a7   : > { %v569_v33 = vsub.f32 %v555_v20, %v568_v32  ;;  %v606_v20 = vld [vmem:[#allocation8 + $0x3] sm:$0x1] }
 0x4a9   : > { %v570_v34 = vmul.f32 %v569_v33, %v569_v33 }
 0x4ab   : > { %v571_v35 = vsel %vm355_vm2, %v570_v34, 0.0 }
 0x4ac   : > { %v572_v36 = vrot.slane %v571_v35, 4 }
 0x4ae   : > { %v573_v37 = vadd.f32 %v572_v36, %v571_v35  ;;  %v923_v36 = vld [vmem:[#allocation8 + $0x8] ss:$0 sm:$0xff] }
 0x4b0   : > { %v574_v38 = vrot.slane %v573_v37, 2 }
 0x4b2   : > { %v575_v39 = vadd.f32 %v574_v38, %v573_v37 }
 0x4b4   : > { %v576_v40 = vrot.slane %v575_v39, 1 }
 0x4b6   : > { %v577_v41 = vadd.f32 %v576_v40, %v575_v39 }
 0x4b8   : > { %v578_v42 = vmul.f32 0.125, %v577_v41 }
 0x4ba   : > { %v579_v43 = vadd.f32 1e-05, %v578_v42 }
 0x4bc   : > { %1094 = vrsqrt.f32 %v579_v43 }
 0x4c6   : > { %v1095_v45 = vpop.eup %1094 }
 0x4c7   : > { %v581_v46 = vmul.f32 %v1095_v45, %v503_v44 }
 0x4c9   : > { %v585_v47 = vrot.slane %v581_v46, %v1614_v31 }
 0x4cb   : > { %v586_v49 = vmul.f32 %v585_v47, %v569_v33 }
 0x4cd   : > { %v591_v50 = vadd.f32 %v918_v48, %v586_v49 }
 0x4cf   : > { %1096 = vtanh.f32 %v591_v50 }
 0x4d9   : > { %v1097_v53 = vpop.eup %1096 }
 0x4da   : > { %v593_v54 = vadd.f32 1.0, %v1097_v53 }
 0x4dc   : > { %595 = vrot.lane.b32.xlu1 %v593_v54, %s1331_s25 }
 0x54e   : > { %v596_v55 = vpop.permute.xlu1 %595 }
 0x54f   : > { %v598_v56 = vmul.f32 %v596_v55, %v591_v50 }
 0x551   : > { %v599_v57 = vadd.f32 %v598_v56, %v497_v18 }
 0x553   : > { %v600_v58 = vmul.f32 0.70710677, %v599_v57 }
 0x555   : > { %v608_v59 = vpack.c.bf16 %v600_v58, %v600_v58 }
 0x557   : > { %972 = vmatmul.mubr.msk.bf16.vlgmr.msra.gmra.mrb[4].mxu1 %vm414_vm3, %v608_v59 }
 0x62a   : > { %v658_v60 = vpop.f32.mrb[4].mxu1 }
 0x62b   : > { %v664_v61 = vsel %vm355_vm2, %v658_v60, 0.0  ;;  %v973_v62 = vpop.f32.mrb[5].mxu1 }
 0x62c   : > { %v665_v63 = vrot.slane %v664_v61, 4  ;;  %v661_v1 = vpop.f32.mrb[6].mxu1 }
 0x62d   : > { %v974_v2 = vpop.f32.mrb[7].mxu1 }
 0x62e   : > { %v666_v3 = vadd.f32 %v665_v63, %v664_v61 }
 0x630   : > { %v667_v4 = vrot.slane %v666_v3, 2 }
 0x632   : > { %v668_v5 = vadd.f32 %v667_v4, %v666_v3 }
 0x634   : > { %v669_v6 = vrot.slane %v668_v5, 1 }
 0x636   : > { %v670_v7 = vadd.f32 %v669_v6, %v668_v5 }
 0x638   : > { %v671_v8 = vmul.f32 0.125, %v670_v7 }
 0x63a   : > { %v672_v9 = vsub.f32 %v658_v60, %v671_v8 }
 0x63c   : > { %v673_v10 = vmul.f32 %v672_v9, %v672_v9 }
 0x63e   : > { %v674_v11 = vsel %vm355_vm2, %v673_v10, 0.0 }
 0x63f   : > { %v675_v12 = vrot.slane %v674_v11, 4 }
 0x641   : > { %v676_v13 = vadd.f32 %v675_v12, %v674_v11 }
 0x643   : > { %v677_v14 = vrot.slane %v676_v13, 2 }
 0x645   : > { %v678_v15 = vadd.f32 %v677_v14, %v676_v13 }
 0x647   : > { %v679_v16 = vrot.slane %v678_v15, 1 }
 0x649   : > { %v680_v17 = vadd.f32 %v679_v16, %v678_v15 }
 0x64b   : > { %v681_v18 = vmul.f32 0.125, %v680_v17 }
 0x64d   : > { %v682_v19 = vadd.f32 1e-05, %v681_v18 }
 0x64f   : > { %1098 = vrsqrt.f32 %v682_v19 }
 0x659   : > { %v1099_v21 = vpop.eup %1098 }
 0x65a   : > { %v684_v22 = vmul.f32 %v1099_v21, %v606_v20 }
 0x65c   : > { %v688_v23 = vrot.slane %v684_v22, %v1614_v31 }
 0x65e   : > { %v689_v25 = vmul.f32 %v688_v23, %v672_v9 }
 0x660   : > { %v694_v26 = vadd.f32 %v922_v24, %v689_v25 }
 0x662   : > { %1100 = vtanh.f32 %v694_v26 }
 0x66c   : > { %v1101_v29 = vpop.eup %1100 }
 0x66d   : > { %v696_v30 = vadd.f32 1.0, %v1101_v29 }
 0x66f   : > { %698 = vrot.lane.b32.xlu1 %v696_v30, %s1331_s25 }
 0x6e1   : > { %v699_v32 = vpop.permute.xlu1 %698 }
 0x6e2   : > { %v701_v33 = vmul.f32 %v699_v32, %v694_v26 }
 0x6e4   : > { %v702_v34 = vadd.f32 %v701_v33, %v600_v58 }
 0x6e6   : > { %v703_v31 = vmul.f32 0.70710677, %v702_v34 }
 0x6e8   : > { %v705_v35 = vpack.c.bf16 %v703_v31, %v703_v31 }
 0x6ea   : > { %980 = vmatmul.mubr.msk.bf16.vlgmr.msra.gmra.mrb[8].mxu0 %vm414_vm3, %v705_v35 }
 0x7bd   : > { %v763_v0 = vpop.f32.mrb[8].mxu0 }
 0x7be   : > { %v764_v37 = vadd.f32 %v923_v36, %v763_v0  ;;  %v981_v38 = vpop.f32.mrb[9].mxu0 }
 0x7bf   : > { %v766_v39 = vpop.f32.mrb[10].mxu0 }
 0x7c0   : > { %v982_v40 = vpop.f32.mrb[11].mxu0  ;;  %769 = vst.msk [vmem:[%s297_s6] sm:$0xff] %vm414_vm3, %v764_v37 }
 0x7c1   : > { %1257 = shalt.err (!%p1254_p12)
}
 0x7c2   : > { %s1258_s7 = scalar_lea.hbm %s1649_s12, 128  ;;  %s1262_s27 = scalar_lea.hbm %s1699_s5, 256 }
 0x7c3   : > { %p1259_p13 = scmp.ne.s32.totalorder %s1649_s12, %s1258_s7  ;;  %p1263_p9 = scmp.lt.u32.totalorder %s1649_s12, %s1699_s5 }
 0x7c4   : > { %p1264_p4 = scmp.lt.u32.totalorder %s1262_s27, %s1258_s7  ;;  %p1266_p6 = scmp.lt.u32.totalorder %s1258_s7, %s1649_s12 }
 0x7c5   : > { %p1260_p3 = pnand %p1259_p13, %p1717_p0 }
 0x7c6   : > { %p1265_p8 = por %p1264_p4, %p1263_p9 }
 0x7c7   : > { %p1261_p7 = pneg %p1260_p3 }
 0x7c8   : > { %p1267_p2 = por %p1266_p6, %p1265_p8 }
 0x7ca   : > { %p1268_p5 = pnand %p1267_p2, %p1261_p7 }
 0x7cc   : > { %1271 = shalt.err (!%p1268_p5)
}
 0x7cd   : > { %1001 = dma.vmem_to_hbm [thread:$0]  (%p1717_p0), %s1651_s30, 128, %s1649_s12, %s771_s24  }
 0x7ce PF: > { %s796_s15 = sand.u32 1, %s1306_s18   ;;  %p1718_p10 = scmp.ne.s32.totalorder %s1710_s14, 0 }
 0x7cf   : > { %p1719_p1 = scmp.ge.s32.totalorder %s1318_s21, 2  ;;  %s797_s6 = scalar_lea.sflag [#allocation4], %s796_s15 }
 0x7d1   : > { %p1021_p11 = pnand %p1719_p1, %p1718_p10 }
 0x7d3   : > { %1301 = dma.done.wait (!%p1021_p11), %s797_s6, 128  }
 0x7d4   : > { %1303 = vsyncadd (!%p1021_p11), %s797_s6, 4294967168  ;;  %p20_p12 = scmp.ge.s32.totalorder %s1508_s11, 4   ;;  %s1720_s18 = smov %s1310_s19 }
 0x7d5   : > { %s1721_s19 = smov %s1314_s20  ;;  %s1722_s20 = smov %s1519_s23 }
 0x7d6   : > { %s1723_s21 = smov %s1508_s11  ;;  %22 = sbr.rel (!%p20_p12) target bundleno = 7 (0x7), region = 103 }
 0x7dd   :  { %802 = vsyncpa [#allocation3], 1 }
 0x7de   :  { %804 = vsyncpa [#allocation3 + $0x1], 1 }
 0x7df   :  { %805 = vsyncpa [#allocation6], 1 }
 0x7e0   :  { %806 = vsyncpa [#allocation9], 1 }
 0x7e1   :  { %807 = vsyncpa [#allocation4], 1 }
 0x7e2   :  { %809 = vsyncpa [#allocation4 + $0x1], 1 }

</bundles_post_ra>
